<compile_context>
chip_gen: v7x
topology: tpu7x:2x2x1
jax: 0.10.0
libtpu: 0.0.40
codegen_flags: <defaults>
</compile_context>

<pallas_src>
import math

import jax
import jax.numpy as jnp
from jax.experimental import pallas as pl
from jax.experimental.pallas import tpu as pltpu


def _bi_interaction_kernel(x_ref, w_ref, wsq_ref, mask_ref, o_ref):
    """x_ref: [tn, F]; w_ref, wsq_ref: [F, K] (resident); mask_ref: [tn, 1];
    o_ref: [tn, K]."""
    x = x_ref[...].astype(jnp.float32)
    # Two tiny matmuls, f32 accumulation.  left/right come out as clean
    # [tn, K] tiles (no concat, no lane slicing).
    left = jnp.dot(x, w_ref[...], preferred_element_type=jnp.float32)
    right = jnp.dot(x * x, wsq_ref[...], preferred_element_type=jnp.float32)
    out = 0.5 * (left * left - right)                       # f32 epilogue
    out = out * mask_ref[...].astype(jnp.float32)           # zero non-train rows
    o_ref[...] = out.astype(o_ref.dtype)


def bi_interaction(x, w, mask, *, block_rows=8192, out_dtype=jnp.bfloat16):
    """x: [N, F] (any float dtype, streamed as-is), w: [F, K] embedding weight,
    mask: [N, 1] (1 for rows in train_idx else 0, any float dtype)
    -> [N, K] out_dtype (default bf16; use jnp.float32 for the exact-f32 path)."""
    N, F = x.shape
    Fw, K = w.shape
    assert Fw == F
    assert mask.shape == (N, 1)

    # Resident weights: W and W*W precomputed once (tiny; stay in VMEM).
    w32 = w.astype(jnp.float32)
    wsq = w32 * w32

    # --- Row-tile selection (no wrapper pad; Pallas handles a ragged tail) ---
    if N > block_rows:
        tn = (block_rows // 16) * 16                 # big tile, mult of 16
    elif N >= 32:
        # Two balanced blocks so v7x megacore gets both TensorCores busy.
        tn = ((pl.cdiv(N, 2) + 15) // 16) * 16
    else:
        tn = N                                       # single tiny block == full dim
    n_blocks = pl.cdiv(N, tn)

    out_bytes = jnp.dtype(out_dtype).itemsize
    cost = pl.CostEstimate(
        flops=2 * 2 * N * F * K + 3 * N * K,
        transcendentals=0,
        bytes_accessed=(x.size * x.dtype.itemsize          # x stream (native dtype)
                        + 2 * F * K * 4                    # resident W, W*W
                        + mask.size * mask.dtype.itemsize  # mask stream
                        + N * K * out_bytes),              # output stream
    )

    return pl.pallas_call(
        _bi_interaction_kernel,
        out_shape=jax.ShapeDtypeStruct((N, K), out_dtype),
        grid_spec=pltpu.PrefetchScalarGridSpec(
            num_scalar_prefetch=0,
            grid=(n_blocks,),
            in_specs=[
                pl.BlockSpec((tn, F), lambda i: (i, 0)),   # x row-block stream
                pl.BlockSpec((F, K), lambda i: (0, 0)),    # W   (resident)
                pl.BlockSpec((F, K), lambda i: (0, 0)),    # W*W (resident)
                pl.BlockSpec((tn, 1), lambda i: (i, 0)),   # row mask stream
            ],
            out_specs=pl.BlockSpec((tn, K), lambda i: (i, 0)),
        ),
        compiler_params=pltpu.CompilerParams(
            # Row axis is embarrassingly parallel -> v7x megacore shards it.
            dimension_semantics=("parallel",),
            # Double-buffered blocks at tn=8192 use ~2.5 MiB; 32 MiB keeps us
            # inside v7x's scoped limit (64 MiB physical) with huge headroom.
            vmem_limit_bytes=32 * 1024 * 1024,
        ),
        cost_estimate=cost,
    )(x, w32, wsq, mask)


def reference_bi_interaction(x, w, mask):
    x32 = x.astype(jnp.float32)
    w32 = w.astype(jnp.float32)
    left = x32 @ w32
    right = (x32 * x32) @ (w32 * w32)
    return 0.5 * (left * left - right) * mask.astype(jnp.float32)


def _make_inputs(key, N, F, K, n_train):
    kx, km, kw, ki = jax.random.split(key, 4)
    # Deterministic Xavier-uniform init of Embedding(in_features, k_embedding).weight
    bound = math.sqrt(6.0 / (F + K))
    w = jax.random.uniform(kw, (F, K), jnp.float32, minval=-bound, maxval=bound)
    # Sparse-ish input (exercises the "nonzero" path of the torch code).
    x = jax.random.normal(kx, (N, F), jnp.float32)
    x = x * (jax.random.uniform(km, (N, F)) < 0.5).astype(jnp.float32)
    # Row mask from train_idx (rows not in train_idx stay zero, as in torch).
    train_idx = jax.random.permutation(ki, N)[:n_train]
    mask = jnp.zeros((N, 1), jnp.bfloat16).at[train_idx, 0].set(1.0)  # 0/1 lossless
    return x, w, mask


if __name__ == "__main__":
    # Shapes consistent with the module: in_features F = 16, k_embedding K = 32.
    key = jax.random.PRNGKey(0)
    k1, k2 = jax.random.split(key)

    # --- Test 1: tiny batch (N=8), single block, exact-f32 output path. -----
    x, w, mask = _make_inputs(k1, N=8, F=16, K=32, n_train=4)
    ref = reference_bi_interaction(x, w, mask)

    out_f32 = jax.block_until_ready(
        bi_interaction(x, w, mask, out_dtype=jnp.float32))
    assert out_f32.shape == (8, 32)
    assert jnp.allclose(out_f32, ref, atol=1e-4, rtol=1e-4), "f32 mismatch vs reference"

    # Default fast path: bf16 output (f32 accumulation; only the store rounds).
    out_bf16 = jax.block_until_ready(bi_interaction(x, w, mask))
    assert out_bf16.dtype == jnp.bfloat16
    assert jnp.allclose(out_bf16.astype(jnp.float32), ref, atol=3e-2, rtol=3e-2), \
        "bf16 mismatch vs reference"

    # --- Test 2: larger batch -> 2 row blocks + ragged tail (no wrapper pad). -
    x2, w2, mask2 = _make_inputs(k2, N=200, F=16, K=32, n_train=120)
    ref2 = reference_bi_interaction(x2, w2, mask2)

    out2 = jax.block_until_ready(bi_interaction(x2, w2, mask2))
    assert out2.shape == (200, 32)
    assert jnp.allclose(out2.astype(jnp.float32), ref2, atol=3e-2, rtol=3e-2), \
        "ragged-tail bf16 mismatch vs reference"
    # Rows outside train_idx must be exactly zero.
    assert jnp.all(jnp.where(mask2 == 0, out2.astype(jnp.float32), 0.0) == 0.0)

    print("KERNEL_OK")
</pallas_src>

<mosaic_0001>
module attributes {stable_mosaic.version = 11 : i64} {
  func.func @_bi_interaction_kernel(%arg0: i32, %arg1: memref<8x16xf32, #tpu.memory_space<vmem>>, %arg2: memref<16x32xf32, #tpu.memory_space<vmem>>, %arg3: memref<16x32xf32, #tpu.memory_space<vmem>>, %arg4: memref<8x1xbf16, #tpu.memory_space<vmem>>, %arg5: memref<8x32xf32, #tpu.memory_space<vmem>>) attributes {dimension_semantics = [#tpu.dimension_semantics<parallel>], iteration_bounds = array<i64: 1>, scalar_prefetch = 0 : i64, scratch_operands = 0 : i64, tpu.core_type = #tpu.core_type<tc>, window_params = [{transform_indices = @transform_0, window_bounds = array<i64: 8, 16>}, {pipeline_mode = #tpu.pipeline_mode<synchronous>, transform_indices = @transform_1, window_bounds = array<i64: 16, 32>}, {pipeline_mode = #tpu.pipeline_mode<synchronous>, transform_indices = @transform_2, window_bounds = array<i64: 16, 32>}, {transform_indices = @transform_3, window_bounds = array<i64: 8, 1>}, {transform_indices = @transform_4, window_bounds = array<i64: 8, 32>}]} {
    %c0 = arith.constant 0 : index
    %c0_0 = arith.constant 0 : index
    %0 = vector.load %arg1[%c0, %c0_0] : memref<8x16xf32, #tpu.memory_space<vmem>>, vector<8x16xf32>
    %c0_1 = arith.constant 0 : index
    %c0_2 = arith.constant 0 : index
    %1 = vector.load %arg2[%c0_1, %c0_2] : memref<16x32xf32, #tpu.memory_space<vmem>>, vector<16x32xf32>
    %cst = arith.constant dense<0.000000e+00> : vector<8x32xf32>
    %2 = tpu.matmul %0, %1, %cst {dimension_numbers = #tpu.dot_dimension_numbers<[1], [0], [0], [1], [0, 0, 1, 1], [], []>} : vector<8x16xf32>, vector<16x32xf32>, vector<8x32xf32> -> vector<8x32xf32>
    %3 = arith.mulf %0, %0 : vector<8x16xf32>
    %c0_3 = arith.constant 0 : index
    %c0_4 = arith.constant 0 : index
    %4 = vector.load %arg3[%c0_3, %c0_4] : memref<16x32xf32, #tpu.memory_space<vmem>>, vector<16x32xf32>
    %cst_5 = arith.constant dense<0.000000e+00> : vector<8x32xf32>
    %5 = tpu.matmul %3, %4, %cst_5 {dimension_numbers = #tpu.dot_dimension_numbers<[1], [0], [0], [1], [0, 0, 1, 1], [], []>} : vector<8x16xf32>, vector<16x32xf32>, vector<8x32xf32> -> vector<8x32xf32>
    %6 = arith.mulf %2, %2 : vector<8x32xf32>
    %7 = arith.subf %6, %5 : vector<8x32xf32>
    %cst_6 = arith.constant 5.000000e-01 : f32
    %8 = vector.broadcast %cst_6 : f32 to vector<8x32xf32>
    %9 = arith.mulf %8, %7 : vector<8x32xf32>
    %c0_7 = arith.constant 0 : index
    %c0_8 = arith.constant 0 : index
    %10 = vector.load %arg4[%c0_7, %c0_8] : memref<8x1xbf16, #tpu.memory_space<vmem>>, vector<8x1xbf16>
    %11 = arith.extf %10 : vector<8x1xbf16> to vector<8x1xf32>
    %12 = vector.broadcast %11 : vector<8x1xf32> to vector<8x32xf32>
    %13 = arith.mulf %9, %12 : vector<8x32xf32>
    %c0_9 = arith.constant 0 : index
    %c0_10 = arith.constant 0 : index
    %14 = vector.load %arg5[%c0_9, %c0_10] : memref<8x32xf32, #tpu.memory_space<vmem>>, vector<8x32xf32>
    tpu.vector_store %arg5[%c0_9, %c0_10], %13 {strides = array<i32>} : memref<8x32xf32, #tpu.memory_space<vmem>>, vector<8x32xf32>,
    return
  }
  func.func @transform_0(%arg0: i32) -> (i32, i32) {
    %c0_i32 = arith.constant 0 : i32
    %c0_i32_0 = arith.constant 0 : i32
    return %arg0, %c0_i32 : i32, i32
  }
  func.func @transform_1(%arg0: i32) -> (i32, i32) {
    %c0_i32 = arith.constant 0 : i32
    %c0_i32_0 = arith.constant 0 : i32
    %c0_i32_1 = arith.constant 0 : i32
    return %c0_i32, %c0_i32_0 : i32, i32
  }
  func.func @transform_2(%arg0: i32) -> (i32, i32) {
    %c0_i32 = arith.constant 0 : i32
    %c0_i32_0 = arith.constant 0 : i32
    %c0_i32_1 = arith.constant 0 : i32
    return %c0_i32, %c0_i32_0 : i32, i32
  }
  func.func @transform_3(%arg0: i32) -> (i32, i32) {
    %c0_i32 = arith.constant 0 : i32
    %c0_i32_0 = arith.constant 0 : i32
    return %arg0, %c0_i32 : i32, i32
  }
  func.func @transform_4(%arg0: i32) -> (i32, i32) {
    %c0_i32 = arith.constant 0 : i32
    %c0_i32_0 = arith.constant 0 : i32
    return %arg0, %c0_i32 : i32, i32
  }
}

</mosaic_0001>

<bundles_post_ra>
// kernel: tpu_custom_call.1
= control target key start
LH: loop header
LB: loop body
LE: loop exit
PB: predicated region body
PF: predicated region fallthrough
CT: control target
= control target key end

     0   :  { %9 = vsyncpa [#allocation3], 0  ;;  %s464_s0 = inlined_call_operand.hbm [shape: f32[8,16], index: 0, kind: input, shape index: {}]   ;;  %s465_s1 = inlined_call_operand.hbm [shape: f32[16,32], index: 1, kind: input, shape index: {}]   ;;  %s466_s2 = inlined_call_operand.hbm [shape: f32[16,32], index: 2, kind: input, shape index: {}]   ;;  %s467_s3 = inlined_call_operand.vmem [shape: bf16[8,1], index: 3, kind: input, shape index: {}]   ;;  %s468_s4 = inlined_call_operand.hbm [shape: f32[8,32], index: 4, kind: output, shape index: {}]  }
   0x1   :  { %10 = vsyncpa [#allocation6], 0 }
   0x2   :  { %11 = vsyncpa [#allocation4], 0  ;;  %s372_s15 = smov [#allocation5]   ;;  %s278_s19 = scalar_lea.hbm %s465_s1, 256 }
   0x3   :  { %s27_s16 = sshll.u32 %s372_s15, 4  ;;  %p279_p0 = scmp.ne.s32.totalorder %s465_s1, %s278_s19  ;;  %s28_s16 = int_to_ptr.vmem [resolvable:$true] %s27_s16 }
   0x4   :  { %p282_p1 = scmp.lt.u32.totalorder %s278_s19, %s465_s1 }
   0x6   :  { %p284_p2 = pnand %p282_p1, %p279_p0 }
   0x8   :  { %287 = shalt.err (!%p284_p2)
}
   0x9   :  { %s288_s24 = scalar_lea.vmem %s28_s16, 256  ;;  %p293_p4 = scmp.lt.s32.totalorder %s28_s16, %s28_s16 }
   0xa   :  { %p289_p3 = scmp.ne.s32.totalorder %s28_s16, %s288_s24  ;;  %p294_p5 = scmp.lt.s32.totalorder %s288_s24, %s288_s24 }
   0xc   :  { %p295_p6 = por %p294_p5, %p293_p4 }
   0xe   :  { %p296_p7 = pnand %p295_p6, %p289_p3 }
  0x10   :  { %299 = shalt.err (!%p296_p7)
}
  0x11   :  { %s373_s25 = smov 128   ;;  %s374_s26 = smov 8  }
  0x12   :  { %33 = dma.hbm_to_vmem [thread:$0]  %s465_s1, 256, %s28_s16, [#allocation6], %s373_s25, %s373_s25, %s374_s26  }
  0x13   :  { %s375_s29 = smov [#allocation2]   ;;  %s376_s5 = smov [#allocation7]  }
  0x14   :  { %s18_s30 = sshll.u32 %s375_s29, 4  ;;  %s39_s6 = sshll.u32 %s376_s5, 4  ;;  %s19_s30 = int_to_ptr.vmem [resolvable:$true] %s18_s30  ;;  %s40_s6 = int_to_ptr.vmem [resolvable:$true] %s39_s6 }
  0x15   :  { %s300_s9 = scalar_lea.hbm %s464_s0, 128 }
  0x16   :  { %p301_p8 = scmp.ne.s32.totalorder %s464_s0, %s300_s9  ;;  %p304_p9 = scmp.lt.u32.totalorder %s300_s9, %s464_s0 }
  0x18   :  { %p306_p10 = pnand %p304_p9, %p301_p8 }
  0x1a   :  { %309 = shalt.err (!%p306_p10)
}
  0x1b   :  { %s310_s1 = scalar_lea.vmem %s19_s30, 128  ;;  %p315_p12 = scmp.lt.s32.totalorder %s19_s30, %s19_s30 }
  0x1c   :  { %p311_p11 = scmp.ne.s32.totalorder %s19_s30, %s310_s1  ;;  %p316_p13 = scmp.lt.s32.totalorder %s310_s1, %s310_s1 }
  0x1e   :  { %p317_p0 = por %p316_p13, %p315_p12 }
  0x20   :  { %p318_p1 = pnand %p317_p0, %p311_p11 }
  0x22   :  { %321 = shalt.err (!%p318_p1)
}
  0x23   :  { %21 = dma.hbm_to_vmem [thread:$0]  %s464_s0, 128, %s19_s30, [#allocation3]  }
  0x24   :  { %s322_s18 = scalar_lea.hbm %s466_s2, 256 }
  0x25   :  { %p323_p2 = scmp.ne.s32.totalorder %s466_s2, %s322_s18  ;;  %p326_p3 = scmp.lt.u32.totalorder %s322_s18, %s466_s2 }
  0x27   :  { %p328_p4 = pnand %p326_p3, %p323_p2 }
  0x29   :  { %331 = shalt.err (!%p328_p4)
}
  0x2a   :  { %s332_s23 = scalar_lea.vmem %s40_s6, 256  ;;  %p337_p6 = scmp.lt.s32.totalorder %s40_s6, %s40_s6 }
  0x2b   :  { %p333_p5 = scmp.ne.s32.totalorder %s40_s6, %s332_s23  ;;  %p338_p7 = scmp.lt.s32.totalorder %s332_s23, %s332_s23 }
  0x2d   :  { %p339_p8 = por %p338_p7, %p337_p6 }
  0x2f   :  { %p340_p9 = pnand %p339_p8, %p333_p5 }
  0x31   :  { %343 = shalt.err (!%p340_p9)
}
  0x32   :  { %45 = dma.hbm_to_vmem [thread:$0]  %s466_s2, 256, %s40_s6, [#allocation6], %s373_s25, %s373_s25, %s374_s26  }
  0x33   :  { %366 = dma.done.wait [#allocation3], 128  }
  0x34   :  { %367 = vsyncadd [#allocation3], 4294967168 }
  0x35   :  { %368 = dma.done.wait [#allocation6], 512  }
  0x36   :  { %369 = vsyncadd [#allocation6], 4294966784  ;;  %v377_v0 = vmov 0.0|0.0   ;;  %vm378_vm0 = vmmov 0   ;;  %v379_v1 = vmov 0.0   ;;  %v380_v2 = vmov 0  }
  0x37   :  { %261 = vmatprep.subr.bf16.mxu0 %v377_v0  ;;  %264 = vmatprep.subr.bf16.mxu1 %v377_v0  ;;  %v58_v3 = vld [vmem:[#allocation5] sm:$0xff]  ;;  %v59_v4 = vld [vmem:[#allocation5 + $0x8] sm:$0xff]  ;;  %v135_v5 = vld [vmem:[#allocation7] sm:$0xff]  ;;  %vm60_vm1 = vcmask 130048   ;;  %s381_s26 = smov [#allocation8]   ;;  %vm221_vm2 = vcmask 261120  }
  0x38   :  { %251 = vmatprep.mubr.msk.f32.mxu0 %vm378_vm0, %v379_v1  ;;  %258 = vmatprep.mubr.msk.f32.mxu1 %vm378_vm0, %v379_v1  ;;  %v262_v6 = vpack.c.bf16 %v59_v4, %v58_v3  ;;  %v136_v7 = vld [vmem:[#allocation7 + $0x8] sm:$0xff]  ;;  %s229_s27 = sshll.u32 %s381_s26, 4  ;;  %s230_s27 = int_to_ptr.vmem [resolvable:$true] %s229_s27 }
  0x39   :  { %277 = vset.pattern.permute.xlu0 %v380_v2  ;;  %v57_v8 = vld [vmem:[#allocation2] sm:$0xff]  ;;  %v265_v10 = vpack.c.bf16 %v136_v7, %v135_v5  ;;  %p349_p11 = scmp.lt.s32.totalorder %s230_s27, %s230_s27 }
  0x3a   :  { %v213_v9 = vld [vmem:[%s467_s3] sm:$0xf]  ;;  %263 = vmatpush3.bf16.msra.mxu0 %v262_v6  ;;  %v134_v12 = vmul.f32 %v57_v8, %v57_v8  ;;  %s344_s3 = scalar_lea.vmem %s230_s27, 128 }
  0x3b   :  { %v214_v11 = vunpack.c.l.bf16 %v213_v9  ;;  %266 = vmatpush3.bf16.msra.mxu1 %v265_v10  ;;  %p345_p10 = scmp.ne.s32.totalorder %s230_s27, %s344_s3  ;;  %p350_p12 = scmp.lt.s32.totalorder %s344_s3, %s344_s3 }
  0x3d   :  { %217 = vperm.xlu0 %277, %v214_v11   ;;  %252 = vmatmul.mubr.msk.f32.vlgmr.msra.gmra.mrb[0].mxu0 %vm60_vm1, %v57_v8  ;;  %p351_p13 = por %p350_p12, %p349_p11 }
  0x3e   :  { %259 = vmatmul.mubr.msk.f32.vlgmr.msra.gmra.mrb[0].mxu1 %vm60_vm1, %v134_v12 }
  0x3f   :  { %p352_p0 = pnand %p351_p13, %p345_p10 }
  0xbc   :  { %v218_v19 = vpop.permute.xlu0 %217 }
 0x110   :  { %v130_v13 = vpop.f32.mrb[0].mxu0 }
 0x111   :  { %v210_v14 = vmul.f32 %v130_v13, %v130_v13  ;;  %v253_v15 = vpop.f32.mrb[1].mxu0  ;;  %v206_v16 = vpop.f32.mrb[0].mxu1 }
 0x112   :  { %v260_v17 = vpop.f32.mrb[1].mxu1 }
 0x113   :  { %v211_v18 = vsub.f32 %v210_v14, %v206_v16 }
 0x115   :  { %v212_v20 = vmul.f32 0.5, %v211_v18 }
 0x117   :  { %v220_v21 = vmul.f32 %v218_v19, %v212_v20 }
 0x119   :  { %222 = vst.msk [vmem:[#allocation8] sm:$0xff] %vm221_vm2, %v220_v21 }
 0x11a   :  { %355 = shalt.err (!%p352_p0)
}
 0x11b   :  { %s356_s30 = scalar_lea.hbm %s468_s4, 128 }
 0x11c   :  { %p357_p1 = scmp.ne.s32.totalorder %s468_s4, %s356_s30  ;;  %p360_p2 = scmp.lt.u32.totalorder %s356_s30, %s468_s4 }
 0x11e   :  { %p362_p3 = pnand %p360_p2, %p357_p1 }
 0x120   :  { %365 = shalt.err (!%p362_p3)
}
 0x121   :  { %232 = dma.vmem_to_hbm [thread:$0]  %s230_s27, 128, %s468_s4, [#allocation4]  }
 0x122   :  { %370 = dma.done.wait [#allocation4], 128  }
 0x123   :  { %371 = vsyncadd [#allocation4], 4294967168 }
 0x124   :  { %236 = vsyncpa [#allocation3], 1 }
 0x125   :  { %237 = vsyncpa [#allocation6], 1 }
 0x126   :  { %238 = vsyncpa [#allocation4], 1 }

</bundles_post_ra>
